<compile_context>
chip_gen: v5e
topology: v5e:2x2
jax: 0.10.0
libtpu: 0.0.40
codegen_flags: <defaults>
</compile_context>

<pallas_src>
import functools

import jax
import jax.numpy as jnp
from jax.experimental import pallas as pl
from jax.experimental.pallas import tpu as pltpu

BN_EPS = 1e-5
VMEM_LIMIT = 64 * 1024 * 1024   # explicit scoped-VMEM budget (fits v5e/v6e/v7x)


def bn_stats_kernel(x_ref, sum_ref, sumsq_ref):
    """Accumulate per-feature sum and sum-of-squares across batch tiles."""
    @pl.when(pl.program_id(0) == 0)
    def _():
        sum_ref[...] = jnp.zeros_like(sum_ref)
        sumsq_ref[...] = jnp.zeros_like(sumsq_ref)

    x = x_ref[...]
    sum_ref[...] += jnp.sum(x, axis=0, keepdims=True)
    sumsq_ref[...] += jnp.sum(x * x, axis=0, keepdims=True)


def mlp_kernel(x_ref, w1_ref, b1_ref, w2_ref, b2_ref, w3_ref, b3_ref,
               w4_ref, b4_ref, o_ref):
    """Fused (BN-folded Linear -> ReLU) x 3 -> Linear for one batch tile.

    Weights arrive as bf16; accumulation is f32 on the MXU; bias/ReLU are f32.
    """
    bf16 = jnp.bfloat16
    h = jnp.dot(x_ref[...].astype(bf16), w1_ref[...],
                preferred_element_type=jnp.float32) + b1_ref[...]
    h = jnp.maximum(h, 0.0)
    h = jnp.dot(h.astype(bf16), w2_ref[...],
                preferred_element_type=jnp.float32) + b2_ref[...]
    h = jnp.maximum(h, 0.0)
    h = jnp.dot(h.astype(bf16), w3_ref[...],
                preferred_element_type=jnp.float32) + b3_ref[...]
    h = jnp.maximum(h, 0.0)
    o_ref[...] = jnp.dot(h.astype(bf16), w4_ref[...],
                         preferred_element_type=jnp.float32) + b4_ref[...]


@functools.partial(jax.jit, static_argnames=("tile_b",))
def mlp_forward(x, params, tile_b=128):
    """Forward pass of MLP(input_dim, output_dim, n_layers=3, hidden_dim)."""
    batch, in_dim = x.shape
    hidden = params["w1"].shape[1]
    out_dim = params["w4"].shape[1]

    tb = tile_b
    num_tiles = -(-batch // tb)
    batch_pad = num_tiles * tb
    x_p = jnp.pad(x, ((0, batch_pad - batch), (0, 0))) if batch_pad != batch else x

    seq_params = pltpu.CompilerParams(
        dimension_semantics=("arbitrary",), vmem_limit_bytes=VMEM_LIMIT)
    par_params = pltpu.CompilerParams(
        dimension_semantics=("parallel",), vmem_limit_bytes=VMEM_LIMIT)

    # ---- Pass 1: full-batch BN statistics (padded zero rows add 0 to sums) ----
    col_sum, col_sumsq = pl.pallas_call(
        bn_stats_kernel,
        out_shape=(jax.ShapeDtypeStruct((1, in_dim), jnp.float32),
                   jax.ShapeDtypeStruct((1, in_dim), jnp.float32)),
        grid_spec=pltpu.PrefetchScalarGridSpec(
            num_scalar_prefetch=0,
            grid=(num_tiles,),
            in_specs=[pl.BlockSpec((tb, in_dim), lambda i: (i, 0))],
            out_specs=(pl.BlockSpec((1, in_dim), lambda i: (0, 0)),
                       pl.BlockSpec((1, in_dim), lambda i: (0, 0)))),
        compiler_params=seq_params,
    )(x_p)

    # ---- Fold BatchNorm (training-mode batch stats, biased var) into Linear 1 ----
    inv_b = jnp.float32(1.0 / batch)
    mean = col_sum * inv_b
    var = jnp.maximum(col_sumsq * inv_b - mean * mean, 0.0)
    s = params["gamma"] * jax.lax.rsqrt(var + BN_EPS)          # (1, in_dim)
    t = params["beta"] - mean * s                              # (1, in_dim)
    w1f = s.T * params["w1"]                                   # (in_dim, hidden) f32
    b1f = t @ params["w1"] + params["b1"]                      # (1, hidden)    f32

    # ---- Pad output features to a multiple of 128 lanes (lane-dense stores) ----
    out_pad = ((out_dim + 127) // 128) * 128
    w4p = jnp.pad(params["w4"], ((0, 0), (0, out_pad - out_dim)))
    b4p = jnp.pad(params["b4"], ((0, 0), (0, out_pad - out_dim)))

    bf16 = jnp.bfloat16

    def full(shape):
        return pl.BlockSpec(shape, lambda i: (0, 0))

    out_p = pl.pallas_call(
        mlp_kernel,
        out_shape=jax.ShapeDtypeStruct((batch_pad, out_pad), jnp.float32),
        grid_spec=pltpu.PrefetchScalarGridSpec(
            num_scalar_prefetch=0,
            grid=(num_tiles,),
            in_specs=[
                pl.BlockSpec((tb, in_dim), lambda i: (i, 0)),   # x batch tile
                full((in_dim, hidden)), full((1, hidden)),      # folded W1, b1
                full((hidden, hidden)), full((1, hidden)),      # W2, b2
                full((hidden, hidden)), full((1, hidden)),      # W3, b3
                full((hidden, out_pad)), full((1, out_pad)),    # W4 (padded), b4
            ],
            out_specs=pl.BlockSpec((tb, out_pad), lambda i: (i, 0))),
        compiler_params=par_params,
    )(x_p,
      w1f.astype(bf16), b1f,
      params["w2"].astype(bf16), params["b2"],
      params["w3"].astype(bf16), params["b3"],
      w4p.astype(bf16), b4p)

    return out_p[:batch, :out_dim]


def init_params(key, input_dim, output_dim, hidden_dim):
    """Deterministic synthetic parameters matching the PyTorch module's shapes."""
    ks = jax.random.split(key, 10)

    def linear(kw, kb, fan_in, fan_out):
        bound = 1.0 / jnp.sqrt(fan_in)
        w = jax.random.uniform(kw, (fan_in, fan_out), jnp.float32, -bound, bound)
        b = jax.random.uniform(kb, (1, fan_out), jnp.float32, -bound, bound)
        return w, b

    w1, b1 = linear(ks[0], ks[1], input_dim, hidden_dim)
    w2, b2 = linear(ks[2], ks[3], hidden_dim, hidden_dim)
    w3, b3 = linear(ks[4], ks[5], hidden_dim, hidden_dim)
    w4, b4 = linear(ks[6], ks[7], hidden_dim, output_dim)
    gamma = 1.0 + 0.1 * jax.random.normal(ks[8], (1, input_dim), jnp.float32)
    beta = 0.1 * jax.random.normal(ks[9], (1, input_dim), jnp.float32)
    return dict(gamma=gamma, beta=beta,
                w1=w1, b1=b1, w2=w2, b2=b2, w3=w3, b3=b3, w4=w4, b4=b4)


def reference_forward(x, p):
    """Pure-JAX f32 reference with the PyTorch module's semantics."""
    mean = jnp.mean(x, axis=0, keepdims=True)
    var = jnp.mean((x - mean) ** 2, axis=0, keepdims=True)   # biased variance
    h = (x - mean) / jnp.sqrt(var + BN_EPS) * p["gamma"] + p["beta"]
    h = jnp.maximum(h @ p["w1"] + p["b1"], 0.0)
    h = jnp.maximum(h @ p["w2"] + p["b2"], 0.0)
    h = jnp.maximum(h @ p["w3"] + p["b3"], 0.0)
    return h @ p["w4"] + p["b4"]


if __name__ == "__main__":
    INPUT_DIM = 16
    OUTPUT_DIM = 8
    HIDDEN_DIM = 128   # module default (n_layers=3, hidden_dim=128)
    BATCH = 256        # 2 batch tiles of 128 -> exercises the grid / pipelining

    key = jax.random.PRNGKey(0)
    kx, kp = jax.random.split(key)
    x = jax.random.normal(kx, (BATCH, INPUT_DIM), jnp.float32)
    params = init_params(kp, INPUT_DIM, OUTPUT_DIM, HIDDEN_DIM)

    out = mlp_forward(x, params)
    jax.block_until_ready(out)

    ref = reference_forward(x, params)
    assert out.shape == (BATCH, OUTPUT_DIM)
    # bf16 MXU matmuls (f32 accumulation) vs the f32 reference: errors are ~1e-3.
    assert jnp.allclose(out, ref, atol=2e-2, rtol=2e-2), float(
        jnp.max(jnp.abs(out - ref)))

    print("KERNEL_OK")
</pallas_src>

<mosaic_0001>
module attributes {stable_mosaic.version = 11 : i64} {
  func.func @bn_stats_kernel(%arg0: i32, %arg1: memref<128x16xf32, #tpu.memory_space<vmem>>, %arg2: memref<1x16xf32, #tpu.memory_space<vmem>>, %arg3: memref<1x16xf32, #tpu.memory_space<vmem>>) attributes {dimension_semantics = [#tpu.dimension_semantics<arbitrary>], iteration_bounds = array<i64: 2>, scalar_prefetch = 0 : i64, scratch_operands = 0 : i64, tpu.core_type = #tpu.core_type<tc>, window_params = [{transform_indices = @transform_0, window_bounds = array<i64: 128, 16>}, {pipeline_mode = #tpu.pipeline_mode<synchronous>, transform_indices = @transform_1, window_bounds = array<i64: 1, 16>}, {pipeline_mode = #tpu.pipeline_mode<synchronous>, transform_indices = @transform_2, window_bounds = array<i64: 1, 16>}]} {
    %c0_i32 = arith.constant 0 : i32
    %0 = arith.cmpi eq, %arg0, %c0_i32 : i32
    %1 = arith.extui %0 : i1 to i32
    %c0_i32_0 = arith.constant 0 : i32
    %2 = arith.cmpi ne, %1, %c0_i32_0 : i32
    scf.if %2 {
      %cst_11 = arith.constant 0.000000e+00 : f32
      %15 = vector.broadcast %cst_11 : f32 to vector<1x16xf32>
      %c0_12 = arith.constant 0 : index
      %c0_13 = arith.constant 0 : index
      %16 = vector.load %arg2[%c0_12, %c0_13] : memref<1x16xf32, #tpu.memory_space<vmem>>, vector<1x16xf32>
      tpu.vector_store %arg2[%c0_12, %c0_13], %15 {strides = array<i32>} : memref<1x16xf32, #tpu.memory_space<vmem>>, vector<1x16xf32>,
      %cst_14 = arith.constant 0.000000e+00 : f32
      %17 = vector.broadcast %cst_14 : f32 to vector<1x16xf32>
      %c0_15 = arith.constant 0 : index
      %c0_16 = arith.constant 0 : index
      %18 = vector.load %arg3[%c0_15, %c0_16] : memref<1x16xf32, #tpu.memory_space<vmem>>, vector<1x16xf32>
      tpu.vector_store %arg3[%c0_15, %c0_16], %17 {strides = array<i32>} : memref<1x16xf32, #tpu.memory_space<vmem>>, vector<1x16xf32>,
    } else {
    }
    %c0 = arith.constant 0 : index
    %c0_1 = arith.constant 0 : index
    %3 = vector.load %arg1[%c0, %c0_1] : memref<128x16xf32, #tpu.memory_space<vmem>>, vector<128x16xf32>
    %c0_2 = arith.constant 0 : index
    %c0_3 = arith.constant 0 : index
    %4 = vector.load %arg2[%c0_2, %c0_3] : memref<1x16xf32, #tpu.memory_space<vmem>>, vector<1x16xf32>
    %cst = arith.constant dense<0.000000e+00> : vector<16xf32>
    %5 = vector.multi_reduction <add>, %3, %cst [0] : vector<128x16xf32> to vector<16xf32>
    %6 = vector.shape_cast %5 : vector<16xf32> to vector<1x16xf32>
    %7 = arith.addf %4, %6 : vector<1x16xf32>
    %c0_4 = arith.constant 0 : index
    %c0_5 = arith.constant 0 : index
    %8 = vector.load %arg2[%c0_4, %c0_5] : memref<1x16xf32, #tpu.memory_space<vmem>>, vector<1x16xf32>
    tpu.vector_store %arg2[%c0_4, %c0_5], %7 {strides = array<i32>} : memref<1x16xf32, #tpu.memory_space<vmem>>, vector<1x16xf32>,
    %c0_6 = arith.constant 0 : index
    %c0_7 = arith.constant 0 : index
    %9 = vector.load %arg3[%c0_6, %c0_7] : memref<1x16xf32, #tpu.memory_space<vmem>>, vector<1x16xf32>
    %10 = arith.mulf %3, %3 : vector<128x16xf32>
    %cst_8 = arith.constant dense<0.000000e+00> : vector<16xf32>
    %11 = vector.multi_reduction <add>, %10, %cst_8 [0] : vector<128x16xf32> to vector<16xf32>
    %12 = vector.shape_cast %11 : vector<16xf32> to vector<1x16xf32>
    %13 = arith.addf %9, %12 : vector<1x16xf32>
    %c0_9 = arith.constant 0 : index
    %c0_10 = arith.constant 0 : index
    %14 = vector.load %arg3[%c0_9, %c0_10] : memref<1x16xf32, #tpu.memory_space<vmem>>, vector<1x16xf32>
    tpu.vector_store %arg3[%c0_9, %c0_10], %13 {strides = array<i32>} : memref<1x16xf32, #tpu.memory_space<vmem>>, vector<1x16xf32>,
    return
  }
  func.func @transform_0(%arg0: i32) -> (i32, i32) {
    %c0_i32 = arith.constant 0 : i32
    %c0_i32_0 = arith.constant 0 : i32
    return %arg0, %c0_i32 : i32, i32
  }
  func.func @transform_1(%arg0: i32) -> (i32, i32) {
    %c0_i32 = arith.constant 0 : i32
    %c0_i32_0 = arith.constant 0 : i32
    %c0_i32_1 = arith.constant 0 : i32
    return %c0_i32, %c0_i32_0 : i32, i32
  }
  func.func @transform_2(%arg0: i32) -> (i32, i32) {
    %c0_i32 = arith.constant 0 : i32
    %c0_i32_0 = arith.constant 0 : i32
    %c0_i32_1 = arith.constant 0 : i32
    return %c0_i32, %c0_i32_0 : i32, i32
  }
}

module attributes {stable_mosaic.version = 11 : i64} {
  func.func @mlp_kernel(%arg0: i32, %arg1: memref<128x16xf32, #tpu.memory_space<vmem>>, %arg2: memref<16x128xbf16, #tpu.memory_space<vmem>>, %arg3: memref<1x128xf32, #tpu.memory_space<vmem>>, %arg4: memref<128x128xbf16, #tpu.memory_space<vmem>>, %arg5: memref<1x128xf32, #tpu.memory_space<vmem>>, %arg6: memref<128x128xbf16, #tpu.memory_space<vmem>>, %arg7: memref<1x128xf32, #tpu.memory_space<vmem>>, %arg8: memref<128x128xbf16, #tpu.memory_space<vmem>>, %arg9: memref<1x128xf32, #tpu.memory_space<vmem>>, %arg10: memref<128x128xf32, #tpu.memory_space<vmem>>) attributes {dimension_semantics = [#tpu.dimension_semantics<parallel>], iteration_bounds = array<i64: 2>, scalar_prefetch = 0 : i64, scratch_operands = 0 : i64, tpu.core_type = #tpu.core_type<tc>, window_params = [{transform_indices = @transform_0, window_bounds = array<i64: 128, 16>}, {pipeline_mode = #tpu.pipeline_mode<synchronous>, transform_indices = @transform_1, window_bounds = array<i64: 16, 128>}, {pipeline_mode = #tpu.pipeline_mode<synchronous>, transform_indices = @transform_2, window_bounds = array<i64: 1, 128>}, {pipeline_mode = #tpu.pipeline_mode<synchronous>, transform_indices = @transform_3, window_bounds = array<i64: 128, 128>}, {pipeline_mode = #tpu.pipeline_mode<synchronous>, transform_indices = @transform_4, window_bounds = array<i64: 1, 128>}, {pipeline_mode = #tpu.pipeline_mode<synchronous>, transform_indices = @transform_5, window_bounds = array<i64: 128, 128>}, {pipeline_mode = #tpu.pipeline_mode<synchronous>, transform_indices = @transform_6, window_bounds = array<i64: 1, 128>}, {pipeline_mode = #tpu.pipeline_mode<synchronous>, transform_indices = @transform_7, window_bounds = array<i64: 128, 128>}, {pipeline_mode = #tpu.pipeline_mode<synchronous>, transform_indices = @transform_8, window_bounds = array<i64: 1, 128>}, {transform_indices = @transform_9, window_bounds = array<i64: 128, 128>}]} {
    %c0 = arith.constant 0 : index
    %c0_0 = arith.constant 0 : index
    %0 = vector.load %arg1[%c0, %c0_0] : memref<128x16xf32, #tpu.memory_space<vmem>>, vector<128x16xf32>
    %1 = arith.truncf %0 : vector<128x16xf32> to vector<128x16xbf16>
    %c0_1 = arith.constant 0 : index
    %c0_2 = arith.constant 0 : index
    %2 = vector.load %arg2[%c0_1, %c0_2] : memref<16x128xbf16, #tpu.memory_space<vmem>>, vector<16x128xbf16>
    %cst = arith.constant dense<0.000000e+00> : vector<128x128xf32>
    %3 = tpu.matmul %1, %2, %cst {dimension_numbers = #tpu.dot_dimension_numbers<[1], [0], [0], [1], [0, 0, 1, 1], [], []>} : vector<128x16xbf16>, vector<16x128xbf16>, vector<128x128xf32> -> vector<128x128xf32>
    %c0_3 = arith.constant 0 : index
    %c0_4 = arith.constant 0 : index
    %4 = vector.load %arg3[%c0_3, %c0_4] : memref<1x128xf32, #tpu.memory_space<vmem>>, vector<1x128xf32>
    %5 = vector.broadcast %4 : vector<1x128xf32> to vector<128x128xf32>
    %6 = arith.addf %3, %5 : vector<128x128xf32>
    %cst_5 = arith.constant 0.000000e+00 : f32
    %7 = vector.broadcast %cst_5 : f32 to vector<128x128xf32>
    %8 = arith.maximumf %6, %7 : vector<128x128xf32>
    %9 = arith.truncf %8 : vector<128x128xf32> to vector<128x128xbf16>
    %c0_6 = arith.constant 0 : index
    %c0_7 = arith.constant 0 : index
    %10 = vector.load %arg4[%c0_6, %c0_7] : memref<128x128xbf16, #tpu.memory_space<vmem>>, vector<128x128xbf16>
    %cst_8 = arith.constant dense<0.000000e+00> : vector<128x128xf32>
    %11 = tpu.matmul %9, %10, %cst_8 {dimension_numbers = #tpu.dot_dimension_numbers<[1], [0], [0], [1], [0, 0, 1, 1], [], []>} : vector<128x128xbf16>, vector<128x128xbf16>, vector<128x128xf32> -> vector<128x128xf32>
    %c0_9 = arith.constant 0 : index
    %c0_10 = arith.constant 0 : index
    %12 = vector.load %arg5[%c0_9, %c0_10] : memref<1x128xf32, #tpu.memory_space<vmem>>, vector<1x128xf32>
    %13 = vector.broadcast %12 : vector<1x128xf32> to vector<128x128xf32>
    %14 = arith.addf %11, %13 : vector<128x128xf32>
    %cst_11 = arith.constant 0.000000e+00 : f32
    %15 = vector.broadcast %cst_11 : f32 to vector<128x128xf32>
    %16 = arith.maximumf %14, %15 : vector<128x128xf32>
    %17 = arith.truncf %16 : vector<128x128xf32> to vector<128x128xbf16>
    %c0_12 = arith.constant 0 : index
    %c0_13 = arith.constant 0 : index
    %18 = vector.load %arg6[%c0_12, %c0_13] : memref<128x128xbf16, #tpu.memory_space<vmem>>, vector<128x128xbf16>
    %cst_14 = arith.constant dense<0.000000e+00> : vector<128x128xf32>
    %19 = tpu.matmul %17, %18, %cst_14 {dimension_numbers = #tpu.dot_dimension_numbers<[1], [0], [0], [1], [0, 0, 1, 1], [], []>} : vector<128x128xbf16>, vector<128x128xbf16>, vector<128x128xf32> -> vector<128x128xf32>
    %c0_15 = arith.constant 0 : index
    %c0_16 = arith.constant 0 : index
    %20 = vector.load %arg7[%c0_15, %c0_16] : memref<1x128xf32, #tpu.memory_space<vmem>>, vector<1x128xf32>
    %21 = vector.broadcast %20 : vector<1x128xf32> to vector<128x128xf32>
    %22 = arith.addf %19, %21 : vector<128x128xf32>
    %cst_17 = arith.constant 0.000000e+00 : f32
    %23 = vector.broadcast %cst_17 : f32 to vector<128x128xf32>
    %24 = arith.maximumf %22, %23 : vector<128x128xf32>
    %25 = arith.truncf %24 : vector<128x128xf32> to vector<128x128xbf16>
    %c0_18 = arith.constant 0 : index
    %c0_19 = arith.constant 0 : index
    %26 = vector.load %arg8[%c0_18, %c0_19] : memref<128x128xbf16, #tpu.memory_space<vmem>>, vector<128x128xbf16>
    %cst_20 = arith.constant dense<0.000000e+00> : vector<128x128xf32>
    %27 = tpu.matmul %25, %26, %cst_20 {dimension_numbers = #tpu.dot_dimension_numbers<[1], [0], [0], [1], [0, 0, 1, 1], [], []>} : vector<128x128xbf16>, vector<128x128xbf16>, vector<128x128xf32> -> vector<128x128xf32>
    %c0_21 = arith.constant 0 : index
    %c0_22 = arith.constant 0 : index
    %28 = vector.load %arg9[%c0_21, %c0_22] : memref<1x128xf32, #tpu.memory_space<vmem>>, vector<1x128xf32>
    %29 = vector.broadcast %28 : vector<1x128xf32> to vector<128x128xf32>
    %30 = arith.addf %27, %29 : vector<128x128xf32>
    %c0_23 = arith.constant 0 : index
    %c0_24 = arith.constant 0 : index
    %31 = vector.load %arg10[%c0_23, %c0_24] : memref<128x128xf32, #tpu.memory_space<vmem>>, vector<128x128xf32>
    tpu.vector_store %arg10[%c0_23, %c0_24], %30 {strides = array<i32>} : memref<128x128xf32, #tpu.memory_space<vmem>>, vector<128x128xf32>,
    return
  }
  func.func @transform_0(%arg0: i32) -> (i32, i32) {
    %c0_i32 = arith.constant 0 : i32
    %c0_i32_0 = arith.constant 0 : i32
    return %arg0, %c0_i32 : i32, i32
  }
  func.func @transform_1(%arg0: i32) -> (i32, i32) {
    %c0_i32 = arith.constant 0 : i32
    %c0_i32_0 = arith.constant 0 : i32
    %c0_i32_1 = arith.constant 0 : i32
    return %c0_i32, %c0_i32_0 : i32, i32
  }
  func.func @transform_2(%arg0: i32) -> (i32, i32) {
    %c0_i32 = arith.constant 0 : i32
    %c0_i32_0 = arith.constant 0 : i32
    %c0_i32_1 = arith.constant 0 : i32
    return %c0_i32, %c0_i32_0 : i32, i32
  }
  func.func @transform_3(%arg0: i32) -> (i32, i32) {
    %c0_i32 = arith.constant 0 : i32
    %c0_i32_0 = arith.constant 0 : i32
    %c0_i32_1 = arith.constant 0 : i32
    return %c0_i32, %c0_i32_0 : i32, i32
  }
  func.func @transform_4(%arg0: i32) -> (i32, i32) {
    %c0_i32 = arith.constant 0 : i32
    %c0_i32_0 = arith.constant 0 : i32
    %c0_i32_1 = arith.constant 0 : i32
    return %c0_i32, %c0_i32_0 : i32, i32
  }
  func.func @transform_5(%arg0: i32) -> (i32, i32) {
    %c0_i32 = arith.constant 0 : i32
    %c0_i32_0 = arith.constant 0 : i32
    %c0_i32_1 = arith.constant 0 : i32
    return %c0_i32, %c0_i32_0 : i32, i32
  }
  func.func @transform_6(%arg0: i32) -> (i32, i32) {
    %c0_i32 = arith.constant 0 : i32
    %c0_i32_0 = arith.constant 0 : i32
    %c0_i32_1 = arith.constant 0 : i32
    return %c0_i32, %c0_i32_0 : i32, i32
  }
  func.func @transform_7(%arg0: i32) -> (i32, i32) {
    %c0_i32 = arith.constant 0 : i32
    %c0_i32_0 = arith.constant 0 : i32
    %c0_i32_1 = arith.constant 0 : i32
    return %c0_i32, %c0_i32_0 : i32, i32
  }
  func.func @transform_8(%arg0: i32) -> (i32, i32) {
    %c0_i32 = arith.constant 0 : i32
    %c0_i32_0 = arith.constant 0 : i32
    %c0_i32_1 = arith.constant 0 : i32
    return %c0_i32, %c0_i32_0 : i32, i32
  }
  func.func @transform_9(%arg0: i32) -> (i32, i32) {
    %c0_i32 = arith.constant 0 : i32
    %c0_i32_0 = arith.constant 0 : i32
    return %arg0, %c0_i32 : i32, i32
  }
}

</mosaic_0001>

<bundles_post_ra>
// kernel: mlp_forward.2
= control target key start
LH: loop header
LB: loop body
LE: loop exit
PB: predicated region body
PF: predicated region fallthrough
CT: control target
= control target key end

     0   :  { %s326_s9 = smov 0   ;;  %s408_s0 = inlined_call_operand.vmem [shape: f32[256,16], index: 0, kind: input, shape index: {}]   ;;  %s409_s1 = inlined_call_operand.vmem [shape: f32[1,16], index: 1, kind: output, shape index: {0}]   ;;  %s410_s2 = inlined_call_operand.vmem [shape: f32[1,16], index: 2, kind: output, shape index: {1}]  }
   0x1 LB: > { %s284_s10 = sadd.s32 4294967295, %s308_s9   ;;  %p287_p0 = scmp.ge.s32.totalorder %s308_s9, 1  ;;  %s308_s9 = sphi %s326_s9, %s13_s9  }
   0x2   : > { %p106_p1 = scmp.lt.s32.totalorder %s308_s9, 3 }
   0x4   : > { %p107_p2 = pnand %p287_p0, %p106_p1 }
   0x5   : > { %s288_s11 = sshll.u32 (!%p107_p2), %s284_s10, 4  ;;  %p290_p4 = scmp.ne.s32.totalorder (!%p107_p2), %s284_s10, 0 }
   0x6   : > { %110 = sbr.rel (%p107_p2) target bundleno = 69 (0x45), region = 24  ;;  %p124_p3 = scmp.lt.s32.totalorder (!%p107_p2), %s288_s11, 31 }
   0xb   : > { %s412_s11 = smov (!%p124_p3, %s288_s11), 31  ;;  %132 = sbr.rel (%p290_p4) target bundleno = 19 (0x13), region = 28 }
   0xc   : > { %s289_s12 = sshll.u32 %s412_s11, 3 }
   0xd   : > { %s337_s15 = scalar_lea.vmem %s408_s0, %s289_s12 }
  0x10   : > { %vm133_vm0 = vcmask 122880   ;;  %v310_v0 = vmov 0.0  }
  0x11   : > { %134 = vst.msk [vmem:[%s409_s1] sm:$0x1] %vm133_vm0, %v310_v0 }
  0x12   : > { %135 = vst.msk [vmem:[%s410_s2] sm:$0x1] %vm133_vm0, %v310_v0 }
  0x13 PF: > { %v136_v1 = vld [vmem:[%s337_s15] sm:$0xff]  ;;  %v137_v2 = vld [vmem:[%s337_s15 + $0x8] sm:$0xff]  ;;  %v138_v3 = vld [vmem:[%s337_s15 + $0x10] sm:$0xff]  ;;  %vm153_vm1 = vcmask 130048   ;;  %vm192_vm2 = vcmask 122880  }
  0x14   : > { %v154_v4 = vsel %vm153_vm1, %v136_v1, 0.0  ;;  %v155_v5 = vsel %vm153_vm1, %v137_v2, 0.0  ;;  %v157_v6 = vsel %vm153_vm1, %v138_v3, 0.0  ;;  %v139_v7 = vld [vmem:[%s337_s15 + $0x18] sm:$0xff]  ;;  %v140_v10 = vld [vmem:[%s337_s15 + $0x20] sm:$0xff]  ;;  %v141_v13 = vld [vmem:[%s337_s15 + $0x28] sm:$0xff]  ;;  %v195_v15 = vmul.f32 %v136_v1, %v136_v1 }
  0x15   : > { %v156_v8 = vadd.f32 %v155_v5, %v154_v4  ;;  %v159_v9 = vsel %vm153_vm1, %v139_v7, 0.0  ;;  %v161_v12 = vsel %vm153_vm1, %v140_v10, 0.0  ;;  %v196_v16 = vmul.f32 %v137_v2, %v137_v2  ;;  %v142_v19 = vld [vmem:[%s337_s15 + $0x30] sm:$0xff]  ;;  %v143_v24 = vld [vmem:[%s337_s15 + $0x38] sm:$0xff]  ;;  %v144_v31 = vld [vmem:[%s337_s15 + $0x40] sm:$0xff] }
  0x16   : > { %v197_v17 = vmul.f32 %v138_v3, %v138_v3  ;;  %v163_v18 = vsel %vm153_vm1, %v141_v13, 0.0  ;;  %v198_v21 = vmul.f32 %v139_v7, %v139_v7  ;;  %v165_v22 = vsel %vm153_vm1, %v142_v19, 0.0  ;;  %v145_v37 = vld [vmem:[%s337_s15 + $0x48] sm:$0xff]  ;;  %v146_v43 = vld [vmem:[%s337_s15 + $0x50] sm:$0xff]  ;;  %v147_v49 = vld [vmem:[%s337_s15 + $0x58] sm:$0xff] }
  0x17   : > { %v158_v11 = vadd.f32 %v157_v6, %v156_v8  ;;  %v199_v23 = vmul.f32 %v140_v10, %v140_v10  ;;  %v211_v26 = vsel %vm153_vm1, %v195_v15, 0.0  ;;  %v212_v27 = vsel %vm153_vm1, %v196_v16, 0.0  ;;  %v148_v55 = vld [vmem:[%s337_s15 + $0x60] sm:$0xff]  ;;  %v149_v61 = vld [vmem:[%s337_s15 + $0x68] sm:$0xff]  ;;  %v150_v3 = vld [vmem:[%s337_s15 + $0x70] sm:$0xff] }
  0x18   : > { %v214_v28 = vsel %vm153_vm1, %v197_v17, 0.0  ;;  %v167_v29 = vsel %vm153_vm1, %v143_v24, 0.0  ;;  %v213_v30 = vadd.f32 %v212_v27, %v211_v26  ;;  %v200_v33 = vmul.f32 %v141_v13, %v141_v13 }
  0x19   : > { %v160_v14 = vadd.f32 %v159_v9, %v158_v11  ;;  %v216_v34 = vsel %vm153_vm1, %v198_v21, 0.0  ;;  %v169_v35 = vsel %vm153_vm1, %v144_v31, 0.0  ;;  %v201_v39 = vmul.f32 %v142_v19, %v142_v19  ;;  %v151_v9 = vld [vmem:[%s337_s15 + $0x78] sm:$0xff] }
  0x1a   : > { %v215_v36 = vadd.f32 %v214_v28, %v213_v30  ;;  %v218_v40 = vsel %vm153_vm1, %v199_v23, 0.0  ;;  %v171_v41 = vsel %vm153_vm1, %v145_v37, 0.0  ;;  %v202_v45 = vmul.f32 %v143_v24, %v143_v24 }
  0x1b   : > { %v162_v20 = vadd.f32 %v161_v12, %v160_v14  ;;  %v220_v46 = vsel %vm153_vm1, %v200_v33, 0.0  ;;  %v173_v47 = vsel %vm153_vm1, %v146_v43, 0.0  ;;  %v203_v51 = vmul.f32 %v144_v31, %v144_v31 }
  0x1c   : > { %v217_v42 = vadd.f32 %v216_v34, %v215_v36  ;;  %v222_v52 = vsel %vm153_vm1, %v201_v39, 0.0  ;;  %v175_v53 = vsel %vm153_vm1, %v147_v49, 0.0  ;;  %v204_v57 = vmul.f32 %v145_v37, %v145_v37  ;;  %v152_v36 = vld [vmem:[%s409_s1] sm:$0x1] }
  0x1d   : > { %v164_v25 = vadd.f32 %v163_v18, %v162_v20  ;;  %v224_v58 = vsel %vm153_vm1, %v202_v45, 0.0  ;;  %v177_v59 = vsel %vm153_vm1, %v148_v55, 0.0  ;;  %v205_v63 = vmul.f32 %v146_v43, %v146_v43 }
  0x1e   : > { %v219_v48 = vadd.f32 %v218_v40, %v217_v42  ;;  %v226_v0 = vsel %vm153_vm1, %v203_v51, 0.0  ;;  %v179_v1 = vsel %vm153_vm1, %v149_v61, 0.0  ;;  %v206_v5 = vmul.f32 %v147_v49, %v147_v49 }
  0x1f   : > { %v166_v32 = vadd.f32 %v165_v22, %v164_v25  ;;  %v228_v6 = vsel %vm153_vm1, %v204_v57, 0.0  ;;  %v181_v7 = vsel %vm153_vm1, %v150_v3, 0.0  ;;  %v207_v11 = vmul.f32 %v148_v55, %v148_v55 }
  0x20   : > { %v221_v54 = vadd.f32 %v220_v46, %v219_v48  ;;  %v230_v12 = vsel %vm153_vm1, %v205_v63, 0.0  ;;  %v183_v13 = vsel %vm153_vm1, %v151_v9, 0.0  ;;  %v208_v16 = vmul.f32 %v149_v61, %v149_v61 }
  0x21   : > { %v168_v38 = vadd.f32 %v167_v29, %v166_v32  ;;  %v232_v17 = vsel %vm153_vm1, %v206_v5, 0.0  ;;  %v209_v20 = vmul.f32 %v150_v3, %v150_v3  ;;  %v234_v21 = vsel %vm153_vm1, %v207_v11, 0.0 }
  0x22   : > { %v223_v60 = vadd.f32 %v222_v52, %v221_v54  ;;  %v210_v24 = vmul.f32 %v151_v9, %v151_v9  ;;  %v236_v25 = vsel %vm153_vm1, %v208_v16, 0.0 }
  0x23   : > { %v170_v44 = vadd.f32 %v169_v35, %v168_v38  ;;  %v238_v28 = vsel %vm153_vm1, %v209_v20, 0.0 }
  0x24   : > { %v225_v2 = vadd.f32 %v224_v58, %v223_v60  ;;  %v240_v31 = vsel %vm153_vm1, %v210_v24, 0.0 }
  0x25   : > { %v172_v50 = vadd.f32 %v171_v41, %v170_v44  ;;  %v194_v44 = vld [vmem:[%s410_s2] sm:$0x1] }
  0x26   : > { %v227_v8 = vadd.f32 %v226_v0, %v225_v2 }
  0x27   : > { %v174_v56 = vadd.f32 %v173_v47, %v172_v50 }
  0x28   : > { %v229_v14 = vadd.f32 %v228_v6, %v227_v8 }
  0x29   : > { %v176_v62 = vadd.f32 %v175_v53, %v174_v56 }
  0x2a   : > { %v231_v18 = vadd.f32 %v230_v12, %v229_v14 }
  0x2b   : > { %v178_v4 = vadd.f32 %v177_v59, %v176_v62 }
  0x2c   : > { %v233_v22 = vadd.f32 %v232_v17, %v231_v18 }
  0x2d   : > { %v180_v10 = vadd.f32 %v179_v1, %v178_v4 }
  0x2e   : > { %v235_v26 = vadd.f32 %v234_v21, %v233_v22 }
  0x2f   : > { %v182_v15 = vadd.f32 %v181_v7, %v180_v10 }
  0x30   : > { %v237_v29 = vadd.f32 %v236_v25, %v235_v26 }
  0x31   : > { %v184_v19 = vadd.f32 %v183_v13, %v182_v15 }
  0x32   : > { %v239_v32 = vadd.f32 %v238_v28, %v237_v29 }
  0x33   : > { %v185_v23 = vrot.slane %v184_v19, 4 }
  0x34   : > { %v241_v34 = vadd.f32 %v240_v31, %v239_v32 }
  0x35   : > { %v186_v27 = vadd.f32 %v185_v23, %v184_v19 }
  0x36   : > { %v242_v37 = vrot.slane %v241_v34, 4 }
  0x37   : > { %v187_v30 = vrot.slane %v186_v27, 2 }
  0x38   : > { %v243_v39 = vadd.f32 %v242_v37, %v241_v34 }
  0x39   : > { %v188_v33 = vadd.f32 %v187_v30, %v186_v27 }
  0x3a   : > { %v244_v41 = vrot.slane %v243_v39, 2 }
  0x3b   : > { %v189_v35 = vrot.slane %v188_v33, 1 }
  0x3c   : > { %v245_v42 = vadd.f32 %v244_v41, %v243_v39 }
  0x3d   : > { %v190_v38 = vadd.f32 %v189_v35, %v188_v33 }
  0x3e   : > { %v246_v43 = vrot.slane %v245_v42, 1 }
  0x3f   : > { %v191_v40 = vadd.f32 %v190_v38, %v152_v36 }
  0x40   : > { %v247_v45 = vadd.f32 %v246_v43, %v245_v42 }
  0x41   : > { %193 = vst.msk [vmem:[%s409_s1] sm:$0x1] %vm192_vm2, %v191_v40 }
  0x42   : > { %v248_v46 = vadd.f32 %v247_v45, %v194_v44 }
  0x44   : > { %249 = vst.msk [vmem:[%s410_s2] sm:$0x1] %vm192_vm2, %v248_v46 }
  0x45 PF: > { %s13_s9 = sadd.s32 1, %s308_s9  }
  0x46   : > { %p10_p5 = scmp.ge.s32.totalorder %s13_s9, 4  }
  0x48   :  { %12 = sbr.rel (!%p10_p5) target bundleno = 1 (0x1), region = 62 }

// kernel: mlp_forward.3
= control target key start
LH: loop header
LB: loop body
LE: loop exit
PB: predicated region body
PF: predicated region fallthrough
CT: control target
= control target key end

     0   :  { %s1156_s30 = smov 0   ;;  %s1347_s0 = inlined_call_operand.vmem [shape: f32[256,16], index: 0, kind: input, shape index: {}]   ;;  %s1348_s1 = inlined_call_operand.vmem [shape: bf16[16,128], index: 1, kind: input, shape index: {}]   ;;  %s1349_s2 = inlined_call_operand.vmem [shape: f32[1,128], index: 2, kind: input, shape index: {}]   ;;  %s1350_s3 = inlined_call_operand.vmem [shape: bf16[128,128], index: 3, kind: input, shape index: {}]   ;;  %s1351_s4 = inlined_call_operand.vmem [shape: f32[1,128], index: 4, kind: input, shape index: {}]   ;;  %s1352_s5 = inlined_call_operand.vmem [shape: bf16[128,128], index: 5, kind: input, shape index: {}]   ;;  %s1353_s6 = inlined_call_operand.vmem [shape: f32[1,128], index: 6, kind: input, shape index: {}]   ;;  %s1354_s7 = inlined_call_operand.vmem [shape: bf16[128,128], index: 7, kind: input, shape index: {}]   ;;  %s1355_s8 = inlined_call_operand.vmem [shape: f32[1,128], index: 8, kind: input, shape index: {}]   ;;  %s1356_s9 = inlined_call_operand.vmem [shape: f32[256,128], index: 9, kind: output, shape index: {}]  }
   0x1 LB: > { %s942_s10 = sadd.s32 4294967295, %s1104_s30   ;;  %p946_p0 = scmp.ge.s32.totalorder %s1104_s30, 1  ;;  %s1104_s30 = sphi %s1156_s30, %s19_s30  }
   0x2   : > { %p288_p1 = scmp.lt.s32.totalorder %s1104_s30, 3 }
   0x4   : > { %p289_p2 = pnand %p946_p0, %p288_p1 }
   0x5   : > { %s947_s13 = sshll.u32 (!%p289_p2), %s942_s10, 4 }
   0x6   : > { %292 = sbr.rel (%p289_p2) target bundleno = 698 (0x2ba), region = 56  ;;  %p325_p3 = scmp.lt.s32.totalorder (!%p289_p2), %s947_s13, 31 }
   0xb   : > { %v1061_v0 = vld [vmem:[%s1348_s1] sm:$0xff]  ;;  %s1358_s13 = smov (!%p325_p3, %s947_s13), 31  ;;  %vm373_vm0 = vcmask 130048   ;;  %v1069_v16 = vld [vmem:[%s1350_s3 + $0x38] sm:$0xff]  ;;  %v1068_v20 = vld [vmem:[%s1350_s3 + $0x30] sm:$0xff] }
   0xc   : > { %405 = vmatpush.bf16.msra.mxu0 %v1061_v0  ;;  %s948_s14 = sshll.u32 %s1358_s13, 3  ;;  %539 = vmatpush.bf16.msra.mxu1 %v1069_v16  ;;  %v1067_v21 = vld [vmem:[%s1350_s3 + $0x28] sm:$0xff]  ;;  %v1066_v22 = vld [vmem:[%s1350_s3 + $0x20] sm:$0xff]  ;;  %v1065_v25 = vld [vmem:[%s1350_s3 + $0x18] sm:$0xff] }
   0xd   : > { %s1175_s17 = scalar_lea.vmem %s1347_s0, %s948_s14  ;;  %v1064_v27 = vld [vmem:[%s1350_s3 + $0x10] sm:$0xff]  ;;  %v1063_v28 = vld [vmem:[%s1350_s3 + $0x8] sm:$0xff]  ;;  %v1062_v29 = vld [vmem:[%s1350_s3] sm:$0xff]  ;;  %s1326_s22 = scalar_lea.vmem %s1356_s9, %s948_s14 }
   0xe   : > { %v337_v1 = vld [vmem:[%s1175_s17] sm:$0xff]  ;;  %v338_v2 = vld [vmem:[%s1175_s17 + $0x8] sm:$0xff]  ;;  %v339_v4 = vld [vmem:[%s1175_s17 + $0x10] sm:$0xff] }
   0xf   : > { %v353_v3 = vpack.c.bf16 %v338_v2, %v337_v1  ;;  %v340_v5 = vld [vmem:[%s1175_s17 + $0x18] sm:$0xff]  ;;  %v341_v7 = vld [vmem:[%s1175_s17 + $0x20] sm:$0xff]  ;;  %v342_v8 = vld [vmem:[%s1175_s17 + $0x28] sm:$0xff] }
  0x10   : > { %v354_v6 = vpack.c.bf16 %v340_v5, %v339_v4  ;;  %v355_v9 = vpack.c.bf16 %v342_v8, %v341_v7  ;;  %v343_v10 = vld [vmem:[%s1175_s17 + $0x30] sm:$0xff]  ;;  %v344_v11 = vld [vmem:[%s1175_s17 + $0x38] sm:$0xff]  ;;  %v345_v13 = vld [vmem:[%s1175_s17 + $0x40] sm:$0xff]  ;;  %540 = vmatpush.bf16.msra.mxu1 %v1068_v20 }
  0x11   : > { %955 = vmatmul.msk.bf16.vlgmr.msra.gmra.mxu0 %vm373_vm0, %v353_v3  ;;  %v356_v12 = vpack.c.bf16 %v344_v11, %v343_v10  ;;  %v346_v14 = vld [vmem:[%s1175_s17 + $0x48] sm:$0xff]  ;;  %v347_v17 = vld [vmem:[%s1175_s17 + $0x50] sm:$0xff]  ;;  %v348_v18 = vld [vmem:[%s1175_s17 + $0x58] sm:$0xff] }
  0x12   : > { %v357_v15 = vpack.c.bf16 %v346_v14, %v345_v13  ;;  %v358_v19 = vpack.c.bf16 %v348_v18, %v347_v17  ;;  %v349_v23 = vld [vmem:[%s1175_s17 + $0x60] sm:$0xff]  ;;  %v350_v24 = vld [vmem:[%s1175_s17 + $0x68] sm:$0xff]  ;;  %v351_v30 = vld [vmem:[%s1175_s17 + $0x70] sm:$0xff] }
  0x13   : > { %v359_v26 = vpack.c.bf16 %v350_v24, %v349_v23  ;;  %v352_v31 = vld [vmem:[%s1175_s17 + $0x78] sm:$0xff]  ;;  %v1228_v34 = vld [vmem:[%s1349_s2] ss:$0 sm:$0xff]  ;;  %v1076_v13 = vld [vmem:[%s1352_s5 + $0x30] sm:$0xff] }
  0x14   : > { %541 = vmatpush.bf16.msra.mxu1 %v1067_v21  ;;  %v360_v32 = vpack.c.bf16 %v352_v31, %v351_v30  ;;  %v1074_v16 = vld [vmem:[%s1352_s5 + $0x20] sm:$0xff]  ;;  %v1073_v20 = vld [vmem:[%s1352_s5 + $0x18] sm:$0xff]  ;;  %v1072_v24 = vld [vmem:[%s1352_s5 + $0x10] sm:$0xff] }
  0x18   : > { %542 = vmatpush.bf16.msra.mxu1 %v1066_v22 }
  0x1c   : > { %543 = vmatpush.bf16.msra.mxu1 %v1065_v25 }
  0x20   : > { %544 = vmatpush.bf16.msra.mxu1 %v1064_v27  ;;  %v1070_v27 = vld [vmem:[%s1352_s5] sm:$0xff] }
  0x21   : > { %956 = vmatmul.msk.bf16.gmra.mxu0 %vm373_vm0, %v354_v6 }
  0x24   : > { %545 = vmatpush.bf16.msra.mxu1 %v1063_v28 }
  0x28   : > { %546 = vmatpush.bf16.msra.mxu1 %v1062_v29 }
  0x31   : > { %957 = vmatmul.msk.bf16.gmra.mxu0 %vm373_vm0, %v355_v9  ;;  %v1077_v9 = vld [vmem:[%s1352_s5 + $0x38] sm:$0xff] }
  0x32   : > { %680 = vmatpush.bf16.msra.mxu2 %v1077_v9 }
  0x36   : > { %681 = vmatpush.bf16.msra.mxu2 %v1076_v13  ;;  %v1085_v13 = vld [vmem:[%s1354_s7 + $0x38] sm:$0xff] }
  0x37   : > { %821 = vmatpush.bf16.msra.mxu3 %v1085_v13 }
  0x41   : > { %958 = vmatmul.msk.bf16.gmra.mxu0 %vm373_vm0, %v356_v12 }
  0x51   : > { %959 = vmatmul.msk.bf16.gmra.mxu0 %vm373_vm0, %v357_v15  ;;  %v1075_v15 = vld [vmem:[%s1352_s5 + $0x28] sm:$0xff] }
  0x52   : > { %682 = vmatpush.bf16.msra.mxu2 %v1075_v15  ;;  %v1084_v15 = vld [vmem:[%s1354_s7 + $0x30] sm:$0xff] }
  0x53   : > { %822 = vmatpush.bf16.msra.mxu3 %v1084_v15 }
  0x56   : > { %683 = vmatpush.bf16.msra.mxu2 %v1074_v16  ;;  %v1083_v16 = vld [vmem:[%s1354_s7 + $0x28] sm:$0xff] }
  0x57   : > { %823 = vmatpush.bf16.msra.mxu3 %v1083_v16 }
  0x5a   : > { %684 = vmatpush.bf16.msra.mxu2 %v1073_v20  ;;  %v1082_v20 = vld [vmem:[%s1354_s7 + $0x20] sm:$0xff] }
  0x5b   : > { %824 = vmatpush.bf16.msra.mxu3 %v1082_v20 }
  0x5e   : > { %685 = vmatpush.bf16.msra.mxu2 %v1072_v24 }
  0x61   : > { %960 = vmatmul.msk.bf16.gmra.mxu0 %vm373_vm0, %v358_v19 }
  0x71   : > { %961 = vmatmul.msk.bf16.gmra.mxu0 %vm373_vm0, %v359_v26  ;;  %v1071_v26 = vld [vmem:[%s1352_s5 + $0x8] sm:$0xff] }
  0x72   : > { %686 = vmatpush.bf16.msra.mxu2 %v1071_v26  ;;  %v1080_v26 = vld [vmem:[%s1354_s7 + $0x10] sm:$0xff] }
  0x76   : > { %687 = vmatpush.bf16.msra.mxu2 %v1070_v27 }
  0x81   : > { %962 = vmatmul.msk.bf16.gmra.mxu0 %vm373_vm0, %v360_v32 }
  0x8e   : > { %v407_v33 = vpop.f32.mrf.mxu0 }
  0x8f   : > { %v408_v35 = vadd.f32 %v1228_v34, %v407_v33 }
  0x91   : > { %v447_v38 = vmax.f32 %v408_v35, 0.0 }
  0x96   : > { %v409_v36 = vpop.f32.mrf.mxu0 }
  0x97   : > { %v410_v37 = vadd.f32 %v1228_v34, %v409_v36  ;;  %v1273_v36 = vld [vmem:[%s1351_s4] ss:$0 sm:$0xff] }
  0x99   : > { %v448_v39 = vmax.f32 %v410_v37, 0.0 }
  0x9b   : > { %v463_v40 = vpack.c.bf16 %v448_v39, %v447_v38 }
  0x9d   : > { %547 = vmatmul.bf16.vlgmr.msra.gmra.mxu1 %v463_v40 }
  0x9e   : > { %v412_v41 = vpop.f32.mrf.mxu0 }
  0x9f   : > { %v413_v42 = vadd.f32 %v1228_v34, %v412_v41 }
  0xa1   : > { %v449_v45 = vmax.f32 %v413_v42, 0.0 }
  0xa6   : > { %v414_v43 = vpop.f32.mrf.mxu0 }
  0xa7   : > { %v415_v44 = vadd.f32 %v1228_v34, %v414_v43 }
  0xa9   : > { %v450_v46 = vmax.f32 %v415_v44, 0.0 }
  0xab   : > { %v464_v47 = vpack.c.bf16 %v450_v46, %v449_v45 }
  0xad   : > { %552 = vmatmul.bf16.gmra.mxu1 %v464_v47 }
  0xae   : > { %v417_v48 = vpop.f32.mrf.mxu0 }
  0xaf   : > { %v418_v49 = vadd.f32 %v1228_v34, %v417_v48 }
  0xb1   : > { %v451_v52 = vmax.f32 %v418_v49, 0.0 }
  0xb6   : > { %v419_v50 = vpop.f32.mrf.mxu0 }
  0xb7   : > { %v420_v51 = vadd.f32 %v1228_v34, %v419_v50 }
  0xb9   : > { %v452_v53 = vmax.f32 %v420_v51, 0.0 }
  0xbb   : > { %v465_v54 = vpack.c.bf16 %v452_v53, %v451_v52 }
  0xbd   : > { %557 = vmatmul.bf16.gmra.mxu1 %v465_v54 }
  0xbe   : > { %v422_v55 = vpop.f32.mrf.mxu0 }
  0xbf   : > { %v423_v56 = vadd.f32 %v1228_v34, %v422_v55 }
  0xc1   : > { %v453_v59 = vmax.f32 %v423_v56, 0.0 }
  0xc6   : > { %v424_v57 = vpop.f32.mrf.mxu0 }
  0xc7   : > { %v425_v58 = vadd.f32 %v1228_v34, %v424_v57 }
  0xc9   : > { %v454_v60 = vmax.f32 %v425_v58, 0.0 }
  0xcb   : > { %v466_v61 = vpack.c.bf16 %v454_v60, %v453_v59 }
  0xcd   : > { %562 = vmatmul.bf16.gmra.mxu1 %v466_v61 }
  0xce   : > { %v427_v62 = vpop.f32.mrf.mxu0 }
  0xcf   : > { %v428_v63 = vadd.f32 %v1228_v34, %v427_v62 }
  0xd1   : > { %v455_v2 = vmax.f32 %v428_v63, 0.0 }
  0xd6   : > { %v429_v0 = vpop.f32.mrf.mxu0 }
  0xd7   : > { %v430_v1 = vadd.f32 %v1228_v34, %v429_v0 }
  0xd9   : > { %v456_v3 = vmax.f32 %v430_v1, 0.0 }
  0xdb   : > { %v467_v4 = vpack.c.bf16 %v456_v3, %v455_v2 }
  0xdd   : > { %567 = vmatmul.bf16.gmra.mxu1 %v467_v4 }
  0xde   : > { %v432_v5 = vpop.f32.mrf.mxu0 }
  0xdf   : > { %v433_v6 = vadd.f32 %v1228_v34, %v432_v5 }
  0xe1   : > { %v457_v10 = vmax.f32 %v433_v6, 0.0 }
  0xe6   : > { %v434_v7 = vpop.f32.mrf.mxu0 }
  0xe7   : > { %v435_v8 = vadd.f32 %v1228_v34, %v434_v7 }
  0xe9   : > { %v458_v11 = vmax.f32 %v435_v8, 0.0 }
  0xeb   : > { %v468_v12 = vpack.c.bf16 %v458_v11, %v457_v10 }
  0xed   : > { %572 = vmatmul.bf16.gmra.mxu1 %v468_v12 }
  0xee   : > { %v437_v14 = vpop.f32.mrf.mxu0 }
  0xef   : > { %v438_v17 = vadd.f32 %v1228_v34, %v437_v14 }
  0xf1   : > { %v459_v21 = vmax.f32 %v438_v17, 0.0 }
  0xf6   : > { %v439_v18 = vpop.f32.mrf.mxu0 }
  0xf7   : > { %v440_v19 = vadd.f32 %v1228_v34, %v439_v18 }
  0xf9   : > { %v460_v22 = vmax.f32 %v440_v19, 0.0 }
  0xfb   : > { %v469_v23 = vpack.c.bf16 %v460_v22, %v459_v21 }
  0xfd   : > { %577 = vmatmul.bf16.gmra.mxu1 %v469_v23 }
  0xfe   : > { %v442_v25 = vpop.f32.mrf.mxu0 }
  0xff   : > { %v443_v28 = vadd.f32 %v1228_v34, %v442_v25  ;;  %v1081_v25 = vld [vmem:[%s1354_s7 + $0x18] sm:$0xff] }
 0x100   : > { %825 = vmatpush.bf16.msra.mxu3 %v1081_v25 }
 0x101   : > { %v461_v31 = vmax.f32 %v443_v28, 0.0 }
 0x104   : > { %826 = vmatpush.bf16.msra.mxu3 %v1080_v26 }
 0x106   : > { %v444_v29 = vpop.f32.mrf.mxu0 }
 0x107   : > { %v445_v30 = vadd.f32 %v1228_v34, %v444_v29  ;;  %v1079_v29 = vld [vmem:[%s1354_s7 + $0x8] sm:$0xff] }
 0x108   : > { %827 = vmatpush.bf16.msra.mxu3 %v1079_v29 }
 0x109   : > { %v462_v32 = vmax.f32 %v445_v30, 0.0 }
 0x10b   : > { %v470_v33 = vpack.c.bf16 %v462_v32, %v461_v31 }
 0x10d   : > { %582 = vmatmul.bf16.gmra.mxu1 %v470_v33  ;;  %v1078_v33 = vld [vmem:[%s1354_s7] sm:$0xff] }
 0x10e   : > { %828 = vmatpush.bf16.msra.mxu3 %v1078_v33 }
 0x11a   : > { %v548_v35 = vpop.f32.mrf.mxu1 }
 0x11b   : > { %v549_v37 = vadd.f32 %v1273_v36, %v548_v35 }
 0x11d   : > { %v588_v40 = vmax.f32 %v549_v37, 0.0 }
 0x122   : > { %v550_v38 = vpop.f32.mrf.mxu1 }
 0x123   : > { %v551_v39 = vadd.f32 %v1273_v36, %v550_v38  ;;  %v1096_v38 = vld [vmem:[%s1353_s6] ss:$0 sm:$0xff] }
 0x125   : > { %v589_v41 = vmax.f32 %v551_v39, 0.0 }
 0x127   : > { %v604_v42 = vpack.c.bf16 %v589_v41, %v588_v40 }
 0x129   : > { %688 = vmatmul.bf16.vlgmr.msra.gmra.mxu2 %v604_v42 }
 0x12a   : > { %v553_v34 = vpop.f32.mrf.mxu1 }
 0x12b   : > { %v554_v43 = vadd.f32 %v1273_v36, %v553_v34 }
 0x12d   : > { %v590_v46 = vmax.f32 %v554_v43, 0.0 }
 0x132   : > { %v555_v44 = vpop.f32.mrf.mxu1 }
 0x133   : > { %v556_v45 = vadd.f32 %v1273_v36, %v555_v44 }
 0x135   : > { %v591_v47 = vmax.f32 %v556_v45, 0.0 }
 0x137   : > { %v605_v48 = vpack.c.bf16 %v591_v47, %v590_v46 }
 0x139   : > { %693 = vmatmul.bf16.gmra.mxu2 %v605_v48 }
 0x13a   : > { %v558_v49 = vpop.f32.mrf.mxu1 }
 0x13b   : > { %v559_v50 = vadd.f32 %v1273_v36, %v558_v49 }
 0x13d   : > { %v592_v53 = vmax.f32 %v559_v50, 0.0 }
 0x142   : > { %v560_v51 = vpop.f32.mrf.mxu1 }
 0x143   : > { %v561_v52 = vadd.f32 %v1273_v36, %v560_v51 }
 0x145   : > { %v593_v54 = vmax.f32 %v561_v52, 0.0 }
 0x147   : > { %v606_v55 = vpack.c.bf16 %v593_v54, %v592_v53 }
 0x149   : > { %698 = vmatmul.bf16.gmra.mxu2 %v606_v55 }
 0x14a   : > { %v563_v56 = vpop.f32.mrf.mxu1 }
 0x14b   : > { %v564_v57 = vadd.f32 %v1273_v36, %v563_v56 }
 0x14d   : > { %v594_v60 = vmax.f32 %v564_v57, 0.0 }
 0x152   : > { %v565_v58 = vpop.f32.mrf.mxu1 }
 0x153   : > { %v566_v59 = vadd.f32 %v1273_v36, %v565_v58 }
 0x155   : > { %v595_v61 = vmax.f32 %v566_v59, 0.0 }
 0x157   : > { %v607_v62 = vpack.c.bf16 %v595_v61, %v594_v60 }
 0x159   : > { %703 = vmatmul.bf16.gmra.mxu2 %v607_v62 }
 0x15a   : > { %v568_v63 = vpop.f32.mrf.mxu1 }
 0x15b   : > { %v569_v0 = vadd.f32 %v1273_v36, %v568_v63 }
 0x15d   : > { %v596_v3 = vmax.f32 %v569_v0, 0.0 }
 0x162   : > { %v570_v1 = vpop.f32.mrf.mxu1 }
 0x163   : > { %v571_v2 = vadd.f32 %v1273_v36, %v570_v1 }
 0x165   : > { %v597_v4 = vmax.f32 %v571_v2, 0.0 }
 0x167   : > { %v608_v5 = vpack.c.bf16 %v597_v4, %v596_v3 }
 0x169   : > { %708 = vmatmul.bf16.gmra.mxu2 %v608_v5 }
 0x16a   : > { %v573_v6 = vpop.f32.mrf.mxu1 }
 0x16b   : > { %v574_v7 = vadd.f32 %v1273_v36, %v573_v6 }
 0x16d   : > { %v598_v10 = vmax.f32 %v574_v7, 0.0 }
 0x172   : > { %v575_v8 = vpop.f32.mrf.mxu1 }
 0x173   : > { %v576_v9 = vadd.f32 %v1273_v36, %v575_v8 }
 0x175   : > { %v599_v11 = vmax.f32 %v576_v9, 0.0 }
 0x177   : > { %v609_v12 = vpack.c.bf16 %v599_v11, %v598_v10 }
 0x179   : > { %713 = vmatmul.bf16.gmra.mxu2 %v609_v12 }
 0x17a   : > { %v578_v14 = vpop.f32.mrf.mxu1 }
 0x17b   : > { %v579_v17 = vadd.f32 %v1273_v36, %v578_v14 }
 0x17d   : > { %v600_v21 = vmax.f32 %v579_v17, 0.0 }
 0x182   : > { %v580_v18 = vpop.f32.mrf.mxu1 }
 0x183   : > { %v581_v19 = vadd.f32 %v1273_v36, %v580_v18 }
 0x185   : > { %v601_v22 = vmax.f32 %v581_v19, 0.0 }
 0x187   : > { %v610_v23 = vpack.c.bf16 %v601_v22, %v600_v21 }
 0x189   : > { %718 = vmatmul.bf16.gmra.mxu2 %v610_v23 }
 0x18a   : > { %v583_v24 = vpop.f32.mrf.mxu1 }
 0x18b   : > { %v584_v27 = vadd.f32 %v1273_v36, %v583_v24 }
 0x18d   : > { %v602_v31 = vmax.f32 %v584_v27, 0.0 }
 0x192   : > { %v585_v28 = vpop.f32.mrf.mxu1 }
 0x193   : > { %v586_v30 = vadd.f32 %v1273_v36, %v585_v28  ;;  %v1097_v28 = vld [vmem:[%s1355_s8] ss:$0 sm:$0xff] }
 0x195   : > { %v603_v32 = vmax.f32 %v586_v30, 0.0 }
 0x197   : > { %v611_v35 = vpack.c.bf16 %v603_v32, %v602_v31 }
 0x199   : > { %723 = vmatmul.bf16.gmra.mxu2 %v611_v35 }
 0x1ac   : > { %v689_v37 = vpop.f32.mrf.mxu2 }
 0x1ad   : > { %v690_v39 = vadd.f32 %v1096_v38, %v689_v37 }
 0x1af   : > { %v729_v42 = vmax.f32 %v690_v39, 0.0 }
 0x1b4   : > { %v691_v40 = vpop.f32.mrf.mxu2 }
 0x1b5   : > { %v692_v41 = vadd.f32 %v1096_v38, %v691_v40 }
 0x1b7   : > { %v730_v36 = vmax.f32 %v692_v41, 0.0 }
 0x1b9   : > { %v745_v34 = vpack.c.bf16 %v730_v36, %v729_v42 }
 0x1bb   : > { %829 = vmatmul.bf16.vlgmr.msra.gmra.mxu3 %v745_v34 }
 0x1bc   : > { %v694_v43 = vpop.f32.mrf.mxu2 }
 0x1bd   : > { %v695_v44 = vadd.f32 %v1096_v38, %v694_v43 }
 0x1bf   : > { %v731_v47 = vmax.f32 %v695_v44, 0.0 }
 0x1c4   : > { %v696_v45 = vpop.f32.mrf.mxu2 }
 0x1c5   : > { %v697_v46 = vadd.f32 %v1096_v38, %v696_v45 }
 0x1c7   : > { %v732_v48 = vmax.f32 %v697_v46, 0.0 }
 0x1c9   : > { %v746_v49 = vpack.c.bf16 %v732_v48, %v731_v47 }
 0x1cb   : > { %834 = vmatmul.bf16.gmra.mxu3 %v746_v49 }
 0x1cc   : > { %v699_v50 = vpop.f32.mrf.mxu2 }
 0x1cd   : > { %v700_v51 = vadd.f32 %v1096_v38, %v699_v50 }
 0x1cf   : > { %v733_v54 = vmax.f32 %v700_v51, 0.0 }
 0x1d4   : > { %v701_v52 = vpop.f32.mrf.mxu2 }
 0x1d5   : > { %v702_v53 = vadd.f32 %v1096_v38, %v701_v52 }
 0x1d7   : > { %v734_v55 = vmax.f32 %v702_v53, 0.0 }
 0x1d9   : > { %v747_v56 = vpack.c.bf16 %v734_v55, %v733_v54 }
 0x1db   : > { %839 = vmatmul.bf16.gmra.mxu3 %v747_v56 }
 0x1dc   : > { %v704_v57 = vpop.f32.mrf.mxu2 }
 0x1dd   : > { %v705_v58 = vadd.f32 %v1096_v38, %v704_v57 }
 0x1df   : > { %v735_v61 = vmax.f32 %v705_v58, 0.0 }
 0x1e4   : > { %v706_v59 = vpop.f32.mrf.mxu2 }
 0x1e5   : > { %v707_v60 = vadd.f32 %v1096_v38, %v706_v59 }
 0x1e7   : > { %v736_v62 = vmax.f32 %v707_v60, 0.0 }
 0x1e9   : > { %v748_v63 = vpack.c.bf16 %v736_v62, %v735_v61 }
 0x1eb   : > { %844 = vmatmul.bf16.gmra.mxu3 %v748_v63 }
 0x1ec   : > { %v709_v0 = vpop.f32.mrf.mxu2 }
 0x1ed   : > { %v710_v1 = vadd.f32 %v1096_v38, %v709_v0 }
 0x1ef   : > { %v737_v4 = vmax.f32 %v710_v1, 0.0 }
 0x1f4   : > { %v711_v2 = vpop.f32.mrf.mxu2 }
 0x1f5   : > { %v712_v3 = vadd.f32 %v1096_v38, %v711_v2 }
 0x1f7   : > { %v738_v5 = vmax.f32 %v712_v3, 0.0 }
 0x1f9   : > { %v749_v6 = vpack.c.bf16 %v738_v5, %v737_v4 }
 0x1fb   : > { %849 = vmatmul.bf16.gmra.mxu3 %v749_v6 }
 0x1fc   : > { %v714_v7 = vpop.f32.mrf.mxu2 }
 0x1fd   : > { %v715_v8 = vadd.f32 %v1096_v38, %v714_v7 }
 0x1ff   : > { %v739_v11 = vmax.f32 %v715_v8, 0.0 }
 0x204   : > { %v716_v9 = vpop.f32.mrf.mxu2 }
 0x205   : > { %v717_v10 = vadd.f32 %v1096_v38, %v716_v9 }
 0x207   : > { %v740_v12 = vmax.f32 %v717_v10, 0.0 }
 0x209   : > { %v750_v13 = vpack.c.bf16 %v740_v12, %v739_v11 }
 0x20b   : > { %854 = vmatmul.bf16.gmra.mxu3 %v750_v13 }
 0x20c   : > { %v719_v14 = vpop.f32.mrf.mxu2 }
 0x20d   : > { %v720_v15 = vadd.f32 %v1096_v38, %v719_v14 }
 0x20f   : > { %v741_v18 = vmax.f32 %v720_v15, 0.0 }
 0x214   : > { %v721_v16 = vpop.f32.mrf.mxu2 }
 0x215   : > { %v722_v17 = vadd.f32 %v1096_v38, %v721_v16 }
 0x217   : > { %v742_v19 = vmax.f32 %v722_v17, 0.0 }
 0x219   : > { %v751_v20 = vpack.c.bf16 %v742_v19, %v741_v18 }
 0x21b   : > { %859 = vmatmul.bf16.gmra.mxu3 %v751_v20 }
 0x21c   : > { %v724_v21 = vpop.f32.mrf.mxu2 }
 0x21d   : > { %v725_v22 = vadd.f32 %v1096_v38, %v724_v21 }
 0x21f   : > { %v743_v25 = vmax.f32 %v725_v22, 0.0 }
 0x224   : > { %v726_v23 = vpop.f32.mrf.mxu2 }
 0x225   : > { %v727_v24 = vadd.f32 %v1096_v38, %v726_v23 }
 0x227   : > { %v744_v26 = vmax.f32 %v727_v24, 0.0 }
 0x229   : > { %v752_v27 = vpack.c.bf16 %v744_v26, %v743_v25 }
 0x22b   : > { %864 = vmatmul.bf16.gmra.mxu3 %v752_v27 }
 0x23e   : > { %v830_v29 = vpop.f32.mrf.mxu3 }
 0x23f   : > { %v831_v30 = vadd.f32 %v1097_v28, %v830_v29 }
 0x241   : > { %870 = vst [vmem:[%s1326_s22] sm:$0xff] %v831_v30 }
 0x246   : > { %v832_v31 = vpop.f32.mrf.mxu3 }
 0x247   : > { %v833_v32 = vadd.f32 %v1097_v28, %v832_v31 }
 0x249   : > { %871 = vst [vmem:[%s1326_s22 + $0x8] sm:$0xff] %v833_v32 }
 0x24e   : > { %v835_v33 = vpop.f32.mrf.mxu3 }
 0x24f   : > { %v836_v35 = vadd.f32 %v1097_v28, %v835_v33 }
 0x251   : > { %872 = vst [vmem:[%s1326_s22 + $0x10] sm:$0xff] %v836_v35 }
 0x256   : > { %v837_v37 = vpop.f32.mrf.mxu3 }
 0x257   : > { %v838_v38 = vadd.f32 %v1097_v28, %v837_v37 }
 0x259   : > { %873 = vst [vmem:[%s1326_s22 + $0x18] sm:$0xff] %v838_v38 }
 0x25e   : > { %v840_v39 = vpop.f32.mrf.mxu3 }
 0x25f   : > { %v841_v40 = vadd.f32 %v1097_v28, %v840_v39 }
 0x261   : > { %874 = vst [vmem:[%s1326_s22 + $0x20] sm:$0xff] %v841_v40 }
 0x266   : > { %v842_v41 = vpop.f32.mrf.mxu3 }
 0x267   : > { %v843_v42 = vadd.f32 %v1097_v28, %v842_v41 }
 0x269   : > { %875 = vst [vmem:[%s1326_s22 + $0x28] sm:$0xff] %v843_v42 }
 0x26e   : > { %v845_v36 = vpop.f32.mrf.mxu3 }
 0x26f   : > { %v846_v34 = vadd.f32 %v1097_v28, %v845_v36 }
 0x271   : > { %876 = vst [vmem:[%s1326_s22 + $0x30] sm:$0xff] %v846_v34 }
 0x276   : > { %v847_v43 = vpop.f32.mrf.mxu3 }
 0x277   : > { %v848_v44 = vadd.f32 %v1097_v28, %v847_v43 }
 0x279   : > { %877 = vst [vmem:[%s1326_s22 + $0x38] sm:$0xff] %v848_v44 }
 0x27e   : > { %v850_v45 = vpop.f32.mrf.mxu3 }
 0x27f   : > { %v851_v46 = vadd.f32 %v1097_v28, %v850_v45 }
 0x281   : > { %878 = vst [vmem:[%s1326_s22 + $0x40] sm:$0xff] %v851_v46 }
 0x286   : > { %v852_v47 = vpop.f32.mrf.mxu3 }
 0x287   : > { %v853_v48 = vadd.f32 %v1097_v28, %v852_v47 }
 0x289   : > { %879 = vst [vmem:[%s1326_s22 + $0x48] sm:$0xff] %v853_v48 }
 0x28e   : > { %v855_v49 = vpop.f32.mrf.mxu3 }
 0x28f   : > { %v856_v50 = vadd.f32 %v1097_v28, %v855_v49 }
 0x291   : > { %880 = vst [vmem:[%s1326_s22 + $0x50] sm:$0xff] %v856_v50 }
 0x296   : > { %v857_v51 = vpop.f32.mrf.mxu3 }
 0x297   : > { %v858_v52 = vadd.f32 %v1097_v28, %v857_v51 }
 0x299   : > { %881 = vst [vmem:[%s1326_s22 + $0x58] sm:$0xff] %v858_v52 }
 0x29e   : > { %v860_v53 = vpop.f32.mrf.mxu3 }
 0x29f   : > { %v861_v54 = vadd.f32 %v1097_v28, %v860_v53 }
 0x2a1   : > { %882 = vst [vmem:[%s1326_s22 + $0x60] sm:$0xff] %v861_v54 }
 0x2a6   : > { %v862_v55 = vpop.f32.mrf.mxu3 }
 0x2a7   : > { %v863_v56 = vadd.f32 %v1097_v28, %v862_v55 }
 0x2a9   : > { %883 = vst [vmem:[%s1326_s22 + $0x68] sm:$0xff] %v863_v56 }
 0x2ae   : > { %v865_v57 = vpop.f32.mrf.mxu3 }
 0x2af   : > { %v866_v58 = vadd.f32 %v1097_v28, %v865_v57 }
 0x2b1   : > { %884 = vst [vmem:[%s1326_s22 + $0x70] sm:$0xff] %v866_v58 }
 0x2b6   : > { %v867_v59 = vpop.f32.mrf.mxu3 }
 0x2b7   : > { %v868_v60 = vadd.f32 %v1097_v28, %v867_v59 }
 0x2b9   : > { %885 = vst [vmem:[%s1326_s22 + $0x78] sm:$0xff] %v868_v60 }
 0x2ba PF: > { %s19_s30 = sadd.s32 1, %s1104_s30  }
 0x2bb   : > { %p16_p4 = scmp.ge.s32.totalorder %s19_s30, 4  }
 0x2bd   :  { %18 = sbr.rel (!%p16_p4) target bundleno = 1 (0x1), region = 86 }

</bundles_post_ra>
